<compile_context>
chip_gen: v7x
topology: tpu7x:2x2x1
jax: 0.10.0
libtpu: 0.0.40
codegen_flags: <defaults>
</compile_context>

<pallas_src>
import math

import jax
import jax.numpy as jnp
from jax.experimental import pallas as pl
from jax.experimental.pallas import tpu as pltpu


def _sin_pos_emb_kernel(x_ref, w_ref, o_ref):
    # x_ref: (tm, K)   w_ref: (K, K*half)   o_ref: (tm, 2*K*half)
    kh = w_ref.shape[1]
    e = jnp.dot(x_ref[...], w_ref[...], preferred_element_type=jnp.float32)
    # Two lane-dense full-width stores (kh is the full half-slab width).
    o_ref[:, :kh] = jnp.sin(e).astype(o_ref.dtype)
    o_ref[:, kh:] = jnp.sin(e + jnp.float32(math.pi / 2)).astype(o_ref.dtype)


def _round_up(v, m):
    return (v + m - 1) // m * m


def _vmem_limit_bytes():
    # Generation-aware scoped-VMEM limit: ~3/4 of physical, capped at 96 MiB.
    # v7x (64 MiB)  -> 48 MiB;  v5e/v6e (128 MiB) -> 96 MiB.
    try:
        cap = pltpu.get_tpu_info().vmem_capacity_bytes
    except Exception:
        cap = 64 << 20  # conservative fallback
    return min(cap * 3 // 4, 96 << 20)


def _choose_tm(M, K, kh, out_dim, out_itemsize, vmem_limit):
    # Account for everything resident in VMEM:
    #   resident constant Wh, double-buffered f32 input tile,
    #   double-buffered output tile, f32 matmul result held before sin.
    resident = K * kh * 4
    per_row = 2 * K * 4 + 2 * out_dim * out_itemsize + kh * 4
    avail = max(vmem_limit - resident - (2 << 20), 1 << 20)
    tm_fit = max(8, (avail // per_row) // 8 * 8)
    tm_max = 1024 if out_dim <= 512 else 512
    tm = min(tm_max, tm_fit)
    # Guarantee >= 2 grid steps so v7x's 2 TensorCores both get work.
    tm = min(tm, max(8, _round_up(-(-M // 2), 8)))
    # Never larger than the (padded) problem itself.
    tm = min(tm, _round_up(M, 8))
    return tm


def sinusoidal_pos_emb(x, dim, *, out_dtype=jnp.float32):
    """x: (B, N, K) float -> (B, N, 2 * K * (dim // 2)) out_dtype."""
    B, N, K = x.shape
    half = dim // 2
    if half < 1:
        raise ValueError("dim must be >= 2")
    if half > 1:
        scale = math.log(10000.0) / (half - 1)
        freqs = jnp.exp(jnp.arange(half, dtype=jnp.float32) * -scale)
    else:
        # torch would divide by zero here (dim == 2); use freq = 1.0 instead.
        freqs = jnp.ones((half,), dtype=jnp.float32)

    kh = K * half            # width of one (sin or cos) slab
    out_dim = 2 * kh
    # NOTE: if kh % 128 != 0 the two stores become masked (vst.msk); for exact
    # torch semantics we keep the true width rather than padding `half`.

    # Block-diagonal broadcast matrix Wh (K, K*half), built without the dense
    # (K, K, half) intermediate: Wh[k, k*half + h] = freqs[h].
    col = jnp.arange(kh)
    Wh = jnp.where(
        (jnp.arange(K)[:, None] == (col // half)[None, :]),
        freqs[col % half][None, :],
        jnp.float32(0.0),
    )

    M = B * N
    vmem_limit = int(_vmem_limit_bytes())
    out_itemsize = jnp.dtype(out_dtype).itemsize
    tm = _choose_tm(M, K, kh, out_dim, out_itemsize, vmem_limit)

    x2 = x.reshape(M, K).astype(jnp.float32)

    out = pl.pallas_call(
        _sin_pos_emb_kernel,
        out_shape=jax.ShapeDtypeStruct((M, out_dim), out_dtype),
        grid_spec=pltpu.PrefetchScalarGridSpec(
            num_scalar_prefetch=0,
            grid=(pl.cdiv(M, tm),),                         # ragged edge handled by Pallas
            in_specs=[
                pl.BlockSpec((tm, K), lambda i: (i, 0)),
                pl.BlockSpec((K, kh), lambda i: (0, 0)),    # resident constant
            ],
            out_specs=pl.BlockSpec((tm, out_dim), lambda i: (i, 0)),
        ),
        compiler_params=pltpu.CompilerParams(
            dimension_semantics=("parallel",),
            vmem_limit_bytes=vmem_limit),
    )(x2, Wh)

    return out.reshape(B, N, out_dim)


def _reference(x, dim):
    half = dim // 2
    scale = math.log(10000.0) / (half - 1)
    freqs = jnp.exp(jnp.arange(half, dtype=jnp.float32) * -scale)
    e = x[:, :, :, None] * freqs[None, None, None, :]
    e = e.reshape(x.shape[0], x.shape[1], -1)
    return jnp.concatenate([jnp.sin(e), jnp.cos(e)], axis=-1)


if __name__ == "__main__":
    B, N, K = 2, 8, 8     # 3-D input, consistent with the module's forward
    dim = 32              # half = 16 -> out last dim = 2 * 8 * 16 = 256

    key = jax.random.PRNGKey(0)
    x = jax.random.normal(key, (B, N, K), dtype=jnp.float32)

    out = sinusoidal_pos_emb(x, dim)
    out = jax.block_until_ready(out)

    ref = _reference(x, dim)
    assert out.shape == ref.shape == (B, N, 2 * K * (dim // 2))
    assert jnp.allclose(out, ref, atol=1e-5, rtol=1e-5)

    print("KERNEL_OK")
</pallas_src>

<mosaic_0001>
module attributes {stable_mosaic.version = 11 : i64} {
  func.func @_sin_pos_emb_kernel(%arg0: i32, %arg1: memref<8x8xf32, #tpu.memory_space<vmem>>, %arg2: memref<8x128xf32, #tpu.memory_space<vmem>>, %arg3: memref<8x256xf32, #tpu.memory_space<vmem>>) attributes {dimension_semantics = [#tpu.dimension_semantics<parallel>], iteration_bounds = array<i64: 2>, scalar_prefetch = 0 : i64, scratch_operands = 0 : i64, tpu.core_type = #tpu.core_type<tc>, window_params = [{transform_indices = @transform_0, window_bounds = array<i64: 8, 8>}, {pipeline_mode = #tpu.pipeline_mode<synchronous>, transform_indices = @transform_1, window_bounds = array<i64: 8, 128>}, {transform_indices = @transform_2, window_bounds = array<i64: 8, 256>}]} {
    %c0 = arith.constant 0 : index
    %c0_0 = arith.constant 0 : index
    %0 = vector.load %arg1[%c0, %c0_0] : memref<8x8xf32, #tpu.memory_space<vmem>>, vector<8x8xf32>
    %c0_1 = arith.constant 0 : index
    %c0_2 = arith.constant 0 : index
    %1 = vector.load %arg2[%c0_1, %c0_2] : memref<8x128xf32, #tpu.memory_space<vmem>>, vector<8x128xf32>
    %cst = arith.constant dense<0.000000e+00> : vector<8x128xf32>
    %2 = tpu.matmul %0, %1, %cst {dimension_numbers = #tpu.dot_dimension_numbers<[1], [0], [0], [1], [0, 0, 1, 1], [], []>} : vector<8x8xf32>, vector<8x128xf32>, vector<8x128xf32> -> vector<8x128xf32>
    %3 = math.sin %2 : vector<8x128xf32>
    %c0_3 = arith.constant 0 : index
    %c0_4 = arith.constant 0 : index
    %4 = vector.load %arg3[%c0_3, %c0_4] : memref<8x256xf32, #tpu.memory_space<vmem>>, vector<8x128xf32>
    tpu.vector_store %arg3[%c0_3, %c0_4], %3 {strides = array<i32>} : memref<8x256xf32, #tpu.memory_space<vmem>>, vector<8x128xf32>,
    %cst_5 = arith.constant 1.57079637 : f32
    %5 = vector.broadcast %cst_5 : f32 to vector<8x128xf32>
    %6 = arith.addf %2, %5 : vector<8x128xf32>
    %7 = math.sin %6 : vector<8x128xf32>
    %c0_6 = arith.constant 0 : index
    %c128 = arith.constant 128 : index
    %8 = vector.load %arg3[%c0_6, %c128] : memref<8x256xf32, #tpu.memory_space<vmem>>, vector<8x128xf32>
    tpu.vector_store %arg3[%c0_6, %c128], %7 {strides = array<i32>} : memref<8x256xf32, #tpu.memory_space<vmem>>, vector<8x128xf32>,
    return
  }
  func.func @transform_0(%arg0: i32) -> (i32, i32) {
    %c0_i32 = arith.constant 0 : i32
    %c0_i32_0 = arith.constant 0 : i32
    return %arg0, %c0_i32 : i32, i32
  }
  func.func @transform_1(%arg0: i32) -> (i32, i32) {
    %c0_i32 = arith.constant 0 : i32
    %c0_i32_0 = arith.constant 0 : i32
    %c0_i32_1 = arith.constant 0 : i32
    return %c0_i32, %c0_i32_0 : i32, i32
  }
  func.func @transform_2(%arg0: i32) -> (i32, i32) {
    %c0_i32 = arith.constant 0 : i32
    %c0_i32_0 = arith.constant 0 : i32
    return %arg0, %c0_i32 : i32, i32
  }
}

</mosaic_0001>

<bundles_post_ra>
// kernel: tpu_custom_call.1
= control target key start
LH: loop header
LB: loop body
LE: loop exit
PB: predicated region body
PF: predicated region fallthrough
CT: control target
= control target key end

     0   :  { %7 = vsyncpa [#allocation3], 0  ;;  %s853_s0 = inlined_call_operand.vmem [shape: f32[16,8], index: 0, kind: input, shape index: {}]   ;;  %s854_s1 = inlined_call_operand.vmem [shape: f32[8,128], index: 1, kind: input, shape index: {}]   ;;  %s855_s2 = inlined_call_operand.hbm [shape: f32[16,256], index: 2, kind: output, shape index: {}]  }
   0x1   :  { %9 = vsyncpa [#allocation3 + $0x1], 0  ;;  %s679_s9 = smov 0   ;;  %s681_s10 = smov 0  }
   0x2   :  { %s683_s11 = smov 0   ;;  %s685_s12 = smov 0  }
   0x3 LB: > { %s700_s13 = sadd.s32 4294967295, %s653_s12   ;;  %s500_s14 = sadd.s32 4294967294, %s653_s12   ;;  %s653_s12 = sphi %s685_s12, %s863_s12   ;;  %s649_s11 = sphi %s683_s11, %s862_s11   ;;  %s645_s10 = sphi %s681_s10, %s861_s10   ;;  %s641_s9 = sphi %s679_s9, %s860_s9  }
   0x4   : > { %s704_s15 = sadd.s32 1, %s653_s12   ;;  %s69_s16 = sadd.s32 1, %s649_s11 }
   0x5   : > { %s66_s17 = ssub.s32 %s653_s12, %s704_s15  ;;  %p79_p0 = scmp.ne.s32.totalorder %s649_s11, %s645_s10 }
   0x6   : > { %p67_p1 = scmp.eq.s32.totalorder %s66_s17, 0  ;;  %p80_p2 = scmp.eq.s32.totalorder %s700_s13, 1 }
   0x7   : > { %p85_p3 = scmp.ne.s32.totalorder %s645_s10, %s641_s9  ;;  %p86_p4 = scmp.eq.s32.totalorder %s500_s14, 1 }
   0x8   : > { %s715_s18 = scalar_select %p67_p1, %s649_s11, %s69_s16  }
   0x9   : > { %p717_p5 = por %p80_p2, %p79_p0  ;;  %p721_p6 = por %p86_p4, %p85_p3 }
   0xa   : > { %p503_p7 = scmp.ge.s32.totalorder %s653_s12, 1  ;;  %p114_p8 = scmp.lt.s32.totalorder %s653_s12, 3 }
   0xc   : > { %p115_p9 = pnand %p503_p7, %p114_p8 }
   0xd   : > { %v140_v0 = vld [vmem:[%s854_s1] sm:$0xff] (!%p115_p9)  ;;  %p135_p10 = scmp.lt.s32.totalorder (!%p115_p9), %s700_s13, 1  ;;  %v655_v1 = vmov (!%p115_p9), 0.0   ;;  %vm656_vm0 = vmmov (!%p115_p9), 0   ;;  %vm141_vm1 = vcmask (!%p115_p9), 64512   ;;  %s132_s28 = sand.u32 (!%p115_p9), 1, %s645_s10  }
   0xe   : > { %118 = sbr.rel (%p115_p9) target bundleno = 342 (0x156), region = 28  ;;  %523 = vmatprep.subr.mxu0 (!%p115_p9), %v655_v1  ;;  %525 = vmatprep.mubr.msk.f32.mxu0 (!%p115_p9), %vm656_vm0, %v655_v1  ;;  %v657_v23 = vmov (!%p115_p9), 683565275   ;;  %v658_v27 = vmov (!%p115_p9), 2475754826   ;;  %s504_s29 = sshll.u32 (!%p115_p9), %s132_s28, 4 }
   0xf   : > { %524 = vmatpush3.msra.mxu0 (!%p115_p9), %v140_v0  ;;  %v659_v29 = vmov (!%p115_p9), 2131351028   ;;  %v660_v31 = vmov (!%p115_p9), 2102212464   ;;  %v661_v33 = vmov (!%p115_p9), 920167782  }
  0x10   : > { %v662_v40 = vmov (!%p115_p9), 1326507024   ;;  %s134_s30 = scalar_lea.vmem (!%p115_p9), [#allocation2], %s504_s29  ;;  %s520_s3 = sshll.u32 (!%p115_p9), %s700_s13, 8 }
  0x11   : > { %s441_s4 = sshll.u32 (!%p115_p9), %s134_s30, 4  ;;  %s809_s7 = scalar_lea.hbm (!%p115_p9), %s855_s2, %s520_s3  ;;  %s811_s4 = int_to_ptr.vmem [resolvable:$true] %s441_s4 }
  0x12   : > { %s427_s8 = scalar_lea.sflag (!%p115_p9), [#allocation3], %s132_s28  ;;  %s663_s14 = smov (!%p115_p9), [#allocation2]  }
  0x13   : > { %s595_s16 = sshll.u32 (!%p115_p9), %s663_s14, 4  ;;  %s596_s16 = int_to_ptr.vmem [resolvable:$false] %s595_s16 }
  0x14   : > { %s597_s17 = scalar_lea.vmem (!%p115_p9), %s596_s16, 512  ;;  %p598_p0 = scmp.lt.s32.totalorder (!%p115_p9), %s811_s4, %s596_s16 }
  0x15   : > { %s136_s23 = scalar_select %p135_p10, %s700_s13, 1 }
  0x16   : > { %s591_s13 = scalar_lea.vmem %s811_s4, 256 }
  0x17   : > { %s505_s24 = sshll.u32 %s136_s23, 3  ;;  %p592_p11 = scmp.ne.s32.totalorder %s811_s4, %s591_s13 }
  0x18   : > { %s138_s27 = scalar_lea.vmem %s853_s0, %s505_s24  ;;  %p599_p1 = scmp.lt.s32.totalorder %s597_s17, %s591_s13 }
  0x19   : > { %v139_v2 = vld [vmem:[%s138_s27] sm:$0xff]  ;;  %p593_p12 = pnand %p592_p11, %p717_p5 }
  0x1a   : > { %526 = vmatmul.mubr.msk.f32.vlgmr.msra.gmra.mrb[0].mxu0 %vm141_vm1, %v139_v2  ;;  %p600_p2 = por %p599_p1, %p598_p0 }
  0x1b   : > { %p594_p13 = pneg %p593_p12 }
  0x1d   : > { %p601_p3 = pnand %p600_p2, %p594_p13 }
  0xed   : > { %v735_v3 = vpop.f32.mrb[0].mxu0 }
  0xee   : > { %v218_v4 = vand.u32 2139095040, %v735_v3  ;;  %v739_v5 = vadd.f32 1.5707964, %v735_v3  ;;  %v527_v6 = vpop.f32.mrb[1].mxu0  ;;  %v215_v9 = vand.u32 2147483647, %v735_v3 }
  0xef   : > { %vm217_vm0 = vcmp.lt.s32.totalorder %v735_v3, 0 }
  0xf0   : > { %v219_v7 = vshrl.u32 %v218_v4, 23  ;;  %v324_v8 = vand.u32 2139095040, %v739_v5  ;;  %v321_v12 = vand.u32 2147483647, %v739_v5  ;;  %v222_v15 = vand.u32 8388607, %v215_v9 }
  0xf1   : > { %vm216_vm1 = vcmp.le.f32.partialorder %v215_v9, 0.7853982 }
  0xf2   : > { %v507_v10 = vadd.s32 4294967169, %v219_v7  ;;  %v325_v11 = vshrl.u32 %v324_v8, 23  ;;  %v328_v17 = vand.u32 8388607, %v321_v12  ;;  %v223_v21 = vor.u32 8388608, %v222_v15 }
  0xf4   : > { %v225_v13 = vadd.s32 1, %v507_v10  ;;  %v511_v14 = vadd.s32 4294967169, %v325_v11  ;;  %v329_v26 = vor.u32 8388608, %v328_v17  ;;  %v263_v59 = vshll.u32 %v223_v21, 8 }
  0xf6   : > { %vm226_vm2 = vcmp.gt.s32.totalorder %v225_v13, 0  ;;  %v331_v16 = vadd.s32 1, %v511_v14  ;;  %v369_v63 = vshll.u32 %v329_v26, 8 }
  0xf7   : > { %v227_v18 = vsel %vm226_vm2, %v225_v13, 0  ;;  %vm323_vm2 = vcmp.lt.s32.totalorder %v739_v5, 0 }
  0xf8   : > { %v228_v19 = vshrl.u32 %v227_v18, 5  ;;  %v229_v20 = vand.u32 31, %v227_v18  ;;  %vm332_vm3 = vcmp.gt.s32.totalorder %v331_v16, 0 }
  0xf9   : > { %v333_v25 = vsel %vm332_vm3, %v331_v16, 0  ;;  %vm792_vm3 = vcmp.le.f32.partialorder %v321_v12, 0.7853982 }
  0xfa   : > { %v230_v22 = vsub.s32 32, %v229_v20  ;;  %v232_v24 = vshll.u32 %v657_v23, %v229_v20  ;;  %v235_v28 = vshll.u32 %v658_v27, %v229_v20  ;;  %v238_v30 = vshll.u32 %v659_v29, %v229_v20 }
  0xfb   : > { %v241_v32 = vshll.u32 %v660_v31, %v229_v20  ;;  %v244_v34 = vshll.u32 %v661_v33, %v229_v20  ;;  %vm247_vm4 = vcmp.lt.s32.totalorder %v228_v19, 1  ;;  %vm248_vm5 = vcmp.lt.s32.totalorder %v228_v19, 2 }
  0xfc   : > { %v233_v35 = vshrl.u32 %v658_v27, %v230_v22  ;;  %v236_v36 = vshrl.u32 %v659_v29, %v230_v22  ;;  %v239_v37 = vshrl.u32 %v660_v31, %v230_v22  ;;  %v231_v38 = vshrl.u32 %v657_v23, %v230_v22 }
  0xfd   : > { %v242_v39 = vshrl.u32 %v661_v33, %v230_v22  ;;  %v245_v41 = vshrl.u32 %v662_v40, %v230_v22  ;;  %vm249_vm6 = vcmp.lt.s32.totalorder %v228_v19, 3  ;;  %vm250_vm7 = vcmp.lt.s32.totalorder %v228_v19, 4 }
  0xfe   : > { %v234_v42 = vor.u32 %v233_v35, %v232_v24  ;;  %v237_v43 = vor.u32 %v236_v36, %v235_v28  ;;  %v240_v44 = vor.u32 %v239_v37, %v238_v30  ;;  %v335_v47 = vand.u32 31, %v333_v25 }
  0xff   : > { %v243_v45 = vor.u32 %v242_v39, %v241_v32  ;;  %v246_v46 = vor.u32 %v245_v41, %v244_v34  ;;  %v334_v7 = vshrl.u32 %v333_v25, 5 }
 0x100   : > { %v251_v48 = vsel %vm247_vm4, %v231_v38, %v234_v42  ;;  %v252_v49 = vsel %vm250_vm7, %v240_v44, 2102212464  ;;  %v255_v50 = vsel %vm247_vm4, %v234_v42, %v237_v43  ;;  %v259_v51 = vsel %vm247_vm4, %v237_v43, %v240_v44 }
 0x101   : > { %v253_v52 = vsel %vm249_vm6, %v237_v43, %v252_v49  ;;  %v256_v53 = vsel %vm250_vm7, %v243_v45, 920167782  ;;  %v260_v54 = vsel %vm250_vm7, %v246_v46, 1326507024  ;;  %v336_v55 = vsub.s32 32, %v335_v47 }
 0x102   : > { %v254_v56 = vsel %vm248_vm5, %v251_v48, %v253_v52  ;;  %v257_v57 = vsel %vm249_vm6, %v240_v44, %v256_v53  ;;  %v261_v58 = vsel %vm249_vm6, %v243_v45, %v260_v54  ;;  %v347_v8 = vshll.u32 %v660_v31, %v335_v47 }
 0x103   : > { %v258_v60 = vsel %vm248_vm5, %v255_v50, %v257_v57  ;;  %v262_v61 = vsel %vm248_vm5, %v259_v51, %v261_v58  ;;  %v348_v62 = vshrl.u32 %v661_v33, %v336_v55  ;;  %v270_v6 = vmul.u32 %v263_v59, %v254_v56 }
 0x104   : > { %v756_v0 = vmul.u32.u64.low %v263_v59, %v262_v61  ;;  %v757_v1 = vmul.u32.u64.high %v263_v59, %v262_v61, %v756_v0  ;;  %v759_v2 = vmul.u32.u64.low %v263_v59, %v258_v60  ;;  %v760_v4 = vmul.u32.u64.high %v263_v59, %v258_v60, %v759_v2 }
 0x105   : > { %v351_v10 = vshrl.u32 %v662_v40, %v336_v55  ;;  %v350_v11 = vshll.u32 %v661_v33, %v335_v47  ;;  %v338_v13 = vshll.u32 %v657_v23, %v335_v47  ;;  %v339_v14 = vshrl.u32 %v658_v27, %v336_v55 }
 0x106   : > { %v342_v15 = vshrl.u32 %v659_v29, %v336_v55  ;;  %v341_v16 = vshll.u32 %v658_v27, %v335_v47  ;;  %v344_v17 = vshll.u32 %v659_v29, %v335_v47  ;;  %v345_v18 = vshrl.u32 %v660_v31, %v336_v55 }
 0x107   : > { %v349_v19 = vor.u32 %v348_v62, %v347_v8  ;;  %vm272_vm8 = vc.u32 %v757_v1, %v759_v2  ;;  %v273_v20 = vadd.s32 1, %v760_v4  ;;  %v352_v21 = vor.u32 %v351_v10, %v350_v11 }
 0x108   : > { %v340_v22 = vor.u32 %v339_v14, %v338_v13  ;;  %v337_v24 = vshrl.u32 %v657_v23, %v336_v55  ;;  %v343_v25 = vor.u32 %v342_v15, %v341_v16  ;;  %v346_v26 = vor.u32 %v345_v18, %v344_v17 }
 0x109   : > { %vm353_vm9 = vcmp.lt.s32.totalorder %v334_v7, 1  ;;  %v274_v28 = vsel %vm272_vm8, %v273_v20, %v760_v4  ;;  %vm354_vm10 = vcmp.lt.s32.totalorder %v334_v7, 2  ;;  %vm355_vm11 = vcmp.lt.s32.totalorder %v334_v7, 3 }
 0x10a   : > { %vm356_vm12 = vcmp.lt.s32.totalorder %v334_v7, 4  ;;  %v275_v27 = vadd.s32 %v274_v28, %v270_v6  ;;  %v361_v30 = vsel %vm353_vm9, %v340_v22, %v343_v25  ;;  %v357_v32 = vsel %vm353_vm9, %v337_v24, %v340_v22 }
 0x10b   : > { %v358_v29 = vsel %vm356_vm12, %v346_v26, 2102212464  ;;  %v362_v31 = vsel %vm356_vm12, %v349_v19, 920167782  ;;  %v365_v34 = vsel %vm353_vm9, %v343_v25, %v346_v26  ;;  %v366_v35 = vsel %vm356_vm12, %v352_v21, 1326507024 }
 0x10c   : > { %v363_v33 = vsel %vm355_vm11, %v346_v26, %v362_v31  ;;  %v276_v36 = vadd.s32 536870912, %v275_v27  ;;  %v359_v37 = vsel %vm355_vm11, %v343_v25, %v358_v29  ;;  %v367_v38 = vsel %vm355_vm11, %v349_v19, %v366_v35 }
 0x10d   : > { %v364_v23 = vsel %vm354_vm10, %v361_v30, %v363_v33  ;;  %v368_v39 = vsel %vm354_vm10, %v365_v34, %v367_v38  ;;  %v360_v45 = vsel %vm354_vm10, %v357_v32, %v359_v37  ;;  %v271_v61 = vadd.s32 %v759_v2, %v757_v1 }
 0x10e   : > { %v771_v40 = vmul.u32.u64.low %v369_v63, %v364_v23  ;;  %v772_v41 = vmul.u32.u64.high %v369_v63, %v364_v23, %v771_v40  ;;  %v277_v42 = vshrl.u32 %v276_v36, 30  ;;  %v376_v49 = vmul.u32 %v369_v63, %v360_v45 }
 0x10f   : > { %v774_v43 = vmul.u32.u64.low %v369_v63, %v368_v39  ;;  %v775_v44 = vmul.u32.u64.high %v369_v63, %v368_v39, %v774_v43  ;;  %vm307_vm7 = vweird.f32 %v735_v3  ;;  %vm413_vm11 = vweird.f32 %v739_v5 }
 0x110   : > { %v278_v46 = vshll.u32 %v277_v42, 30  ;;  %v379_v47 = vadd.s32 1, %v772_v41  ;;  %v301_v19 = vsub.s32 4, %v277_v42 }
 0x111   : > { %vm378_vm13 = vc.u32 %v775_v44, %v771_v40  ;;  %v377_v1 = vadd.s32 %v771_v40, %v775_v44 }
 0x112   : > { %v279_v48 = vsub.s32 %v275_v27, %v278_v46  ;;  %v380_v50 = vsel %vm378_vm13, %v379_v47, %v772_v41  ;;  %v302_v27 = vsel %vm217_vm0, %v301_v19, %v277_v42 }
 0x113   : > { %v381_v52 = vadd.s32 %v380_v50, %v376_v49  ;;  %v304_v32 = vsel %vm216_vm1, 0, %v302_v27 }
 0x114   : > { %v281_v51 = vsub.s32 0, %v279_v48  ;;  %v308_v36 = vadd.s32 3, %v304_v32 }
 0x115   : > { %v382_v54 = vadd.s32 536870912, %v381_v52 }
 0x116   : > { %v508_v53 = vmin.u32 %v281_v51, %v279_v48  ;;  %v309_v9 = vand.u32 3, %v308_v36 }
 0x117   : > { %v383_v56 = vshrl.u32 %v382_v54, 30 }
 0x118   : > { %v283_v55 = vclz %v508_v53  ;;  %vm314_vm4 = vcmp.eq.s32.totalorder %v309_v9, 2  ;;  %vm311_vm5 = vcmp.eq.s32.totalorder %v309_v9, 0  ;;  %vm310_vm6 = vcmp.lt.s32.totalorder %v309_v9, 2 }
 0x119   : > { %v384_v58 = vshll.u32 %v383_v56, 30  ;;  %v407_v23 = vsub.s32 4, %v383_v56 }
 0x11a   : > { %v509_v57 = vadd.s32 4294967294, %v283_v55 }
 0x11b   : > { %v385_v60 = vsub.s32 %v381_v52, %v384_v58  ;;  %v408_v41 = vsel %vm323_vm2, %v407_v23, %v383_v56 }
 0x11c   : > { %vm510_vm14 = vcmp.lt.s32.totalorder %v509_v57, 0  ;;  %v410_v12 = vsel %vm792_vm3, 0, %v408_v41 }
 0x11d   : > { %v286_v59 = vsel %vm510_vm14, 0, %v509_v57  ;;  %v387_v0 = vsub.s32 0, %v385_v60  ;;  %v414_v50 = vadd.s32 3, %v410_v12 }
 0x11e   : > { %v287_v62 = vsub.s32 32, %v286_v59  ;;  %v291_v63 = vsub.s32 4294967266, %v286_v59  ;;  %v288_v4 = vshll.u32 %v279_v48, %v286_v59 }
 0x11f   : > { %v512_v8 = vmin.u32 %v387_v0, %v385_v60  ;;  %v415_v52 = vand.u32 3, %v414_v50 }
 0x120   : > { %v289_v6 = vshrl.u32 %v271_v61, %v287_v62  ;;  %v292_v7 = vadd.s32 127, %v291_v63 }
 0x121   : > { %v389_v13 = vclz %v512_v8  ;;  %vm420_vm8 = vcmp.eq.s32.totalorder %v415_v52, 2  ;;  %vm417_vm9 = vcmp.eq.s32.totalorder %v415_v52, 0  ;;  %vm416_vm10 = vcmp.lt.s32.totalorder %v415_v52, 2 }
 0x122   : > { %v290_v10 = vor.u32 %v289_v6, %v288_v4  ;;  %v293_v11 = vshll.u32 %v292_v7, 23 }
 0x123   : > { %v513_v15 = vadd.s32 4294967294, %v389_v13 }
 0x124   : > { %v294_v14 = vor.u32 4788187, %v293_v11  ;;  %v297_v17 = vcvt.s32.f32 %v290_v10 }
 0x125   : > { %vm514_vm15 = vcmp.lt.s32.totalorder %v513_v15, 0 }
 0x126   : > { %v295_v16 = vand.u32 2147483647, %v294_v14  ;;  %v392_v20 = vsel %vm514_vm15, 0, %v513_v15 }
 0x127   : > { %v393_v2 = vsub.s32 32, %v392_v20  ;;  %v397_v21 = vsub.s32 4294967266, %v392_v20  ;;  %v394_v24 = vshll.u32 %v385_v60, %v392_v20 }
 0x128   : > { %v298_v18 = vmul.f32 %v297_v17, %v295_v16 }
 0x129   : > { %v395_v25 = vshrl.u32 %v377_v1, %v393_v2  ;;  %v398_v26 = vadd.s32 127, %v397_v21 }
 0x12a   : > { %v299_v22 = vxor.u32 2147483648, %v298_v18 }
 0x12b   : > { %v396_v30 = vor.u32 %v395_v25, %v394_v24  ;;  %v399_v31 = vshll.u32 %v398_v26, 23 }
 0x12c   : > { %v300_v28 = vsel %vm217_vm0, %v299_v22, %v298_v18 }
 0x12d   : > { %v303_v29 = vsel %vm216_vm1, %v735_v3, %v300_v28  ;;  %v400_v33 = vor.u32 4788187, %v399_v31  ;;  %v403_v35 = vcvt.s32.f32 %v396_v30 }
 0x12e   : > { %583 = vcosq.f32 %v303_v29 }
 0x12f   : > { %585 = vsinq.f32 %v303_v29  ;;  %v401_v34 = vand.u32 2147483647, %v400_v33 }
 0x131   : > { %v404_v37 = vmul.f32 %v403_v35, %v401_v34 }
 0x133   : > { %v405_v38 = vxor.u32 2147483648, %v404_v37 }
 0x135   : > { %v406_v40 = vsel %vm323_vm2, %v405_v38, %v404_v37 }
 0x136   : > { %v409_v43 = vsel %vm792_vm3, %v739_v5, %v406_v40 }
 0x137   : > { %587 = vcosq.f32 %v409_v43 }
 0x138   : > { %v584_v42 = vpop.eup %583  ;;  %589 = vsinq.f32 %v409_v43 }
 0x139   : > { %v586_v44 = vpop.eup %585  ;;  %v315_v45 = vxor.u32 2147483648, %v584_v42 }
 0x13a   : > { %v312_v46 = vxor.u32 2147483648, %v586_v44 }
 0x13b   : > { %v316_v47 = vsel %vm314_vm4, %v315_v45, %v586_v44 }
 0x13c   : > { %v313_v48 = vsel %vm311_vm5, %v584_v42, %v312_v46 }
 0x13d   : > { %v317_v49 = vsel %vm310_vm6, %v313_v48, %v316_v47 }
 0x13e   : > { %v318_v51 = vsel %vm307_vm7, nan, %v317_v49 }
 0x13f   : > { %319 = vst [vmem:[%s134_s30] sm:$0xff] %v318_v51 }
 0x141   : > { %v588_v53 = vpop.eup %587 }
 0x142   : > { %v590_v54 = vpop.eup %589  ;;  %v421_v55 = vxor.u32 2147483648, %v588_v53 }
 0x143   : > { %v418_v56 = vxor.u32 2147483648, %v590_v54 }
 0x144   : > { %v422_v57 = vsel %vm420_vm8, %v421_v55, %v590_v54 }
 0x145   : > { %v419_v58 = vsel %vm417_vm9, %v588_v53, %v418_v56 }
 0x146   : > { %v423_v3 = vsel %vm416_vm10, %v419_v58, %v422_v57 }
 0x147   : > { %v424_v59 = vsel %vm413_vm11, nan, %v423_v3 }
 0x148   : > { %425 = vst [vmem:[%s134_s30 + $0x8] sm:$0xff] %v424_v59 }
 0x149   : > { %604 = shalt.err (!%p601_p3)
}
 0x14a   : > { %s605_s21 = scalar_lea.hbm %s809_s7, 256  ;;  %s609_s24 = scalar_lea.hbm %s855_s2, 512 }
 0x14b   : > { %p606_p4 = scmp.ne.s32.totalorder %s809_s7, %s605_s21  ;;  %p610_p9 = scmp.lt.u32.totalorder %s809_s7, %s855_s2 }
 0x14c   : > { %p611_p10 = scmp.lt.u32.totalorder %s609_s24, %s605_s21  ;;  %p613_p12 = scmp.lt.u32.totalorder %s605_s21, %s809_s7 }
 0x14d   : > { %p607_p7 = pnand %p606_p4, %p717_p5 }
 0x14e   : > { %p612_p11 = por %p611_p10, %p610_p9 }
 0x14f   : > { %p608_p8 = pneg %p607_p7 }
 0x150   : > { %p614_p13 = por %p613_p12, %p612_p11 }
 0x152   : > { %p615_p0 = pnand %p614_p13, %p608_p8 }
 0x154   : > { %618 = shalt.err (!%p615_p0)
}
 0x155   : > { %536 = dma.vmem_to_hbm [thread:$0]  (%p717_p5), %s811_s4, 256, %s809_s7, %s427_s8  }
 0x156 PF: > { %p542_p1 = scmp.ge.s32.totalorder %s653_s12, 2  ;;  %s453_s27 = sand.u32 1, %s641_s9  }
 0x157   : > { %s454_s28 = scalar_lea.sflag [#allocation3], %s453_s27 }
 0x158   : > { %p539_p2 = pnand %p542_p1, %p721_p6 }
 0x15a   : > { %636 = dma.done.wait (!%p539_p2), %s454_s28, 256  }
 0x15b   : > { %638 = vsyncadd (!%p539_p2), %s454_s28, 4294967040  ;;  %p12_p3 = scmp.ge.s32.totalorder %s704_s15, 4   ;;  %s860_s9 = smov %s645_s10 }
 0x15c   : > { %s861_s10 = smov %s649_s11  ;;  %s862_s11 = smov %s715_s18 }
 0x15d   : > { %s863_s12 = smov %s704_s15  ;;  %14 = sbr.rel (!%p12_p3) target bundleno = 3 (0x3), region = 63 }
 0x164   :  { %459 = vsyncpa [#allocation3], 1 }
 0x165   :  { %461 = vsyncpa [#allocation3 + $0x1], 1 }

</bundles_post_ra>
